<compile_context>
chip_gen: v6e
topology: v6e:2x2x1
jax: 0.10.0
libtpu: 0.0.40
codegen_flags: <defaults>
</compile_context>

<pallas_src>
import math
from functools import partial

import jax
import jax.numpy as jnp
from jax import lax
from jax.experimental import pallas as pl
from jax.experimental.pallas import tpu as pltpu


# ----------------------------------------------------------------------------
# Kernel body (specialized per variant)
# ----------------------------------------------------------------------------
def _make_rmsnorm_kernel(has_residual: bool, has_bias: bool, prenorm: bool,
                         eps: float, inv_d: float):
    """Build a kernel body specialized on (has_residual, has_bias, prenorm)."""

    def kernel(*refs):
        idx = 0
        x_ref = refs[idx]; idx += 1
        r_ref = None
        if has_residual:
            r_ref = refs[idx]; idx += 1
        w_ref = refs[idx]; idx += 1
        b_ref = None
        if has_bias:
            b_ref = refs[idx]; idx += 1
        out_refs = refs[idx:]
        out_ref = out_refs[0]

        # upcast=True semantics: all math in fp32.
        x = x_ref[...].astype(jnp.float32)
        if has_residual:
            x = x + r_ref[...].astype(jnp.float32)
        if prenorm:
            # Pre-norm value; dtype of the output buffer decides fp32 vs activation dtype.
            out_refs[1][...] = x.astype(out_refs[1].dtype)

        # mean(x^2) = sum(x^2) * (1/D), folded into the rsqrt argument.
        ss = jnp.sum(x * x, axis=-1, keepdims=True)
        inv = lax.rsqrt(ss * inv_d + eps)
        y = x * inv * w_ref[...]            # weight pre-cast to fp32 in the wrapper
        if has_bias:
            y = y + b_ref[...]
        out_ref[...] = y.astype(out_ref.dtype)

    return kernel


# ----------------------------------------------------------------------------
# VMEM budget (generation aware)
# ----------------------------------------------------------------------------
def _default_vmem_budget_bytes() -> int:
    cap = None
    try:
        info = pltpu.get_tpu_info()
        cap = getattr(info, "vmem_capacity_bytes", None)
    except Exception:
        cap = None
    if not cap:
        kind = ""
        try:
            kind = jax.devices()[0].device_kind.lower()
        except Exception:
            pass
        # v7x has 64 MiB VMEM per TensorCore; v5e/v6e have 128 MiB.
        cap = 64 * 1024 * 1024 if "v7" in kind else 128 * 1024 * 1024
    # Leave headroom for compiler scratch; never budget above 64 MiB.
    return int(min(cap * 3 // 4, 64 * 1024 * 1024))


# ----------------------------------------------------------------------------
# Wrapper (rms_norm_fn equivalent)
# ----------------------------------------------------------------------------
def rms_norm(
    x,
    weight,
    bias=None,
    residual=None,
    *,
    eps: float = 1e-5,
    prenorm: bool = False,
    residual_in_fp32: bool = True,      # True matches the upcast=True reference exactly
    min_block_bytes: int = 2 * 1024 * 1024,
    vmem_budget_bytes: int | None = None,
    pipeline_depth: int = 2,
):
    """Fused residual-add + RMSNorm. x: (..., D); weight/bias: (D,)."""
    orig_dtype = x.dtype
    orig_shape = x.shape
    D = orig_shape[-1]
    M = math.prod(orig_shape) // D

    x2 = x.reshape(M, D)
    w2 = weight.reshape(1, D).astype(jnp.float32)   # pre-cast once (perf cleanup)
    has_residual = residual is not None
    has_bias = bias is not None
    if has_residual:
        r2 = residual.reshape(M, D)
    if has_bias:
        b2 = bias.reshape(1, D).astype(jnp.float32)

    prenorm_dtype = jnp.float32 if residual_in_fp32 else orig_dtype

    if vmem_budget_bytes is None:
        vmem_budget_bytes = _default_vmem_budget_bytes()
    buffers = max(2, int(pipeline_depth))

    # ---- per-row VMEM cost: pipeline-buffered streams + fp32 temporaries -------------
    x_b = jnp.dtype(x.dtype).itemsize
    r_b = jnp.dtype(residual.dtype).itemsize if has_residual else 0
    o_b = jnp.dtype(orig_dtype).itemsize
    p_b = jnp.dtype(prenorm_dtype).itemsize if prenorm else 0
    stream_per_row = D * (x_b + r_b + o_b + p_b)
    temp_per_row = 3 * D * 4                       # fp32 upcast x, x*x, broadcast product
    per_row = buffers * stream_per_row + temp_per_row
    tm_cap = max(8, (vmem_budget_bytes // per_row) // 8 * 8)

    # ---- choose TM: hit a bytes-per-block target, bounded by the VMEM cap ------------
    tm_target = -(-min_block_bytes // max(1, D * x_b))     # rows to reach target bytes
    tm_target = max(8, ((tm_target + 7) // 8) * 8)
    TM = min(tm_cap, tm_target, M)

    # Guarantee >= 2 grid steps (pipeline overlap + 2-TC sharding on v7x) when M allows.
    if M > 8:
        half = -(-M // 2)
        half8 = ((half + 7) // 8) * 8
        TM = min(TM, half8)
    if TM < M:
        TM = max(8, (TM // 8) * 8)      # (8, 128) sublane constraint for partial tiles
    grid = (pl.cdiv(M, TM),)

    # ---- derive the scoped-VMEM limit from the actual footprint ----------------------
    footprint = (buffers * TM * stream_per_row
                 + TM * temp_per_row
                 + buffers * D * 4 * (1 + int(has_bias)))
    vmem_limit = int(min(vmem_budget_bytes,
                         max(32 * 1024 * 1024, footprint * 5 // 4 + (2 << 20))))

    # ---- specs ------------------------------------------------------------------------
    def _row_spec():
        if buffers > 2:
            return pl.BlockSpec((TM, D), lambda i: (i, 0), pipeline_mode=pl.Buffered(buffers))
        return pl.BlockSpec((TM, D), lambda i: (i, 0))

    w_spec = pl.BlockSpec((1, D), lambda i: (0, 0))

    in_specs = [_row_spec()]
    inputs = [x2]
    if has_residual:
        in_specs.append(_row_spec())
        inputs.append(r2)
    in_specs.append(w_spec)
    inputs.append(w2)
    if has_bias:
        in_specs.append(w_spec)
        inputs.append(b2)

    out_shapes = [jax.ShapeDtypeStruct((M, D), orig_dtype)]
    out_specs = [_row_spec()]
    if prenorm:
        out_shapes.append(jax.ShapeDtypeStruct((M, D), prenorm_dtype))
        out_specs.append(_row_spec())

    kernel = _make_rmsnorm_kernel(has_residual, has_bias, prenorm, float(eps), 1.0 / D)

    outs = pl.pallas_call(
        kernel,
        out_shape=tuple(out_shapes),
        grid=grid,
        in_specs=in_specs,
        out_specs=tuple(out_specs),
        compiler_params=pltpu.CompilerParams(
            dimension_semantics=("parallel",),
            vmem_limit_bytes=vmem_limit,
        ),
    )(*inputs)

    out = outs[0].reshape(orig_shape)
    if prenorm:
        return out, outs[1].reshape(orig_shape)
    return out


# ----------------------------------------------------------------------------
# Module-like convenience wrapper (mirrors the PyTorch RMSNorm module)
# ----------------------------------------------------------------------------
class RMSNorm:
    def __init__(self, hidden_size, eps=1e-5, dtype=jnp.float32):
        self.eps = eps
        self.weight = jnp.ones((hidden_size,), dtype)   # reset_parameters(): ones_
        self.bias = None                                 # register_parameter('bias', None)

    def __call__(self, x, residual=None, prenorm=False, residual_in_fp32=False):
        # The PyTorch reference calls rms_norm_fn(..., upcast=True), which always
        # returns the pre-norm value in fp32 (residual_in_fp32 is ignored there); we
        # preserve those semantics by forcing the fp32 prenorm store. Callers that want
        # the bandwidth-saving bf16 prenorm can call rms_norm(residual_in_fp32=False).
        return rms_norm(x, self.weight, bias=self.bias, residual=residual,
                        eps=self.eps, prenorm=prenorm, residual_in_fp32=True)


# ----------------------------------------------------------------------------
# Pure-JAX reference (for correctness checks)
# ----------------------------------------------------------------------------
def _ref_rms_norm(x, w, bias=None, residual=None, eps=1e-5):
    xf = x.astype(jnp.float32)
    if residual is not None:
        xf = xf + residual.astype(jnp.float32)
    ms = jnp.mean(xf * xf, axis=-1, keepdims=True)
    o = xf * lax.rsqrt(ms + eps) * w.astype(jnp.float32)
    if bias is not None:
        o = o + bias.astype(jnp.float32)
    return o.astype(x.dtype), xf


if __name__ == "__main__":
    key = jax.random.PRNGKey(0)
    k1, k2, k3, k4, k5 = jax.random.split(key, 5)

    # Case 1: module-sized config, residual + prenorm, fp32 (M=16 -> grid of 2).
    B, L, D = 2, 8, 32
    x = jax.random.normal(k1, (B, L, D), jnp.float32)
    r = jax.random.normal(k2, (B, L, D), jnp.float32)
    w = 1.0 + 0.1 * jax.random.normal(k3, (D,), jnp.float32)

    out, res = rms_norm(x, w, residual=r, prenorm=True)
    out, res = jax.block_until_ready((out, res))
    ref_out, ref_res = _ref_rms_norm(x, w, residual=r)
    assert out.shape == (B, L, D) and res.shape == (B, L, D)
    assert res.dtype == jnp.float32
    assert jnp.allclose(out, ref_out, atol=1e-5, rtol=1e-5)
    assert jnp.allclose(res, ref_res, atol=1e-6, rtol=1e-6)

    # Case 2: no residual / no prenorm, bf16 activations, multiple row tiles with a
    # ragged last tile (M = 3*37 = 111 rows -> grid of 2 with a 55-row tail).
    B2, L2, D2 = 3, 37, 256
    xb = jax.random.normal(k4, (B2, L2, D2), jnp.float32).astype(jnp.bfloat16)
    norm = RMSNorm(D2)
    outb = jax.block_until_ready(norm(xb))
    refb, _ = _ref_rms_norm(xb, norm.weight)
    assert outb.dtype == jnp.bfloat16
    assert jnp.allclose(outb.astype(jnp.float32), refb.astype(jnp.float32),
                        atol=2e-2, rtol=2e-2)

    # Case 3: bias path (rms_norm_fn contract), fp32.
    b = 0.05 * jax.random.normal(k5, (D,), jnp.float32)
    out3 = jax.block_until_ready(rms_norm(x, w, bias=b))
    ref3, _ = _ref_rms_norm(x, w, bias=b)
    assert jnp.allclose(out3, ref3, atol=1e-5, rtol=1e-5)

    # Case 4: bandwidth-saving prenorm store in activation dtype (residual_in_fp32=False).
    xb4 = x.astype(jnp.bfloat16)
    rb4 = r.astype(jnp.bfloat16)
    out4, res4 = jax.block_until_ready(
        rms_norm(xb4, w, residual=rb4, prenorm=True, residual_in_fp32=False))
    ref4, ref_res4 = _ref_rms_norm(xb4, w, residual=rb4)
    assert out4.dtype == jnp.bfloat16 and res4.dtype == jnp.bfloat16
    assert jnp.allclose(out4.astype(jnp.float32), ref4.astype(jnp.float32),
                        atol=2e-2, rtol=2e-2)
    assert jnp.allclose(res4.astype(jnp.float32), ref_res4, atol=2e-2, rtol=2e-2)

    print("KERNEL_OK")
</pallas_src>

<mosaic_0001>
module attributes {stable_mosaic.version = 11 : i64} {
  func.func @kernel(%arg0: i32, %arg1: memref<8x32xf32, #tpu.memory_space<vmem>>, %arg2: memref<8x32xf32, #tpu.memory_space<vmem>>, %arg3: memref<1x32xf32, #tpu.memory_space<vmem>>, %arg4: memref<8x32xf32, #tpu.memory_space<vmem>>, %arg5: memref<8x32xf32, #tpu.memory_space<vmem>>) attributes {dimension_semantics = [#tpu.dimension_semantics<parallel>], iteration_bounds = array<i64: 2>, scalar_prefetch = 0 : i64, scratch_operands = 0 : i64, tpu.core_type = #tpu.core_type<tc>, window_params = [{transform_indices = @transform_0, window_bounds = array<i64: 8, 32>}, {transform_indices = @transform_1, window_bounds = array<i64: 8, 32>}, {pipeline_mode = #tpu.pipeline_mode<synchronous>, transform_indices = @transform_2, window_bounds = array<i64: 1, 32>}, {transform_indices = @transform_3, window_bounds = array<i64: 8, 32>}, {transform_indices = @transform_4, window_bounds = array<i64: 8, 32>}]} {
    %c0 = arith.constant 0 : index
    %c0_0 = arith.constant 0 : index
    %0 = vector.load %arg1[%c0, %c0_0] : memref<8x32xf32, #tpu.memory_space<vmem>>, vector<8x32xf32>
    %c0_1 = arith.constant 0 : index
    %c0_2 = arith.constant 0 : index
    %1 = vector.load %arg2[%c0_1, %c0_2] : memref<8x32xf32, #tpu.memory_space<vmem>>, vector<8x32xf32>
    %2 = arith.addf %0, %1 : vector<8x32xf32>
    %c0_3 = arith.constant 0 : index
    %c0_4 = arith.constant 0 : index
    %3 = vector.load %arg5[%c0_3, %c0_4] : memref<8x32xf32, #tpu.memory_space<vmem>>, vector<8x32xf32>
    tpu.vector_store %arg5[%c0_3, %c0_4], %2 {strides = array<i32>} : memref<8x32xf32, #tpu.memory_space<vmem>>, vector<8x32xf32>,
    %4 = arith.mulf %2, %2 : vector<8x32xf32>
    %cst = arith.constant dense<0.000000e+00> : vector<8xf32>
    %5 = vector.multi_reduction <add>, %4, %cst [1] : vector<8x32xf32> to vector<8xf32>
    %6 = vector.shape_cast %5 : vector<8xf32> to vector<8x1xf32>
    %cst_5 = arith.constant 3.125000e-02 : f32
    %7 = vector.broadcast %cst_5 : f32 to vector<8x1xf32>
    %8 = arith.mulf %6, %7 : vector<8x1xf32>
    %cst_6 = arith.constant 9.99999974E-6 : f32
    %9 = vector.broadcast %cst_6 : f32 to vector<8x1xf32>
    %10 = arith.addf %8, %9 : vector<8x1xf32>
    %11 = math.rsqrt %10 : vector<8x1xf32>
    %12 = vector.broadcast %11 : vector<8x1xf32> to vector<8x32xf32>
    %13 = arith.mulf %2, %12 : vector<8x32xf32>
    %c0_7 = arith.constant 0 : index
    %c0_8 = arith.constant 0 : index
    %14 = vector.load %arg3[%c0_7, %c0_8] : memref<1x32xf32, #tpu.memory_space<vmem>>, vector<1x32xf32>
    %15 = vector.broadcast %14 : vector<1x32xf32> to vector<8x32xf32>
    %16 = arith.mulf %13, %15 : vector<8x32xf32>
    %c0_9 = arith.constant 0 : index
    %c0_10 = arith.constant 0 : index
    %17 = vector.load %arg4[%c0_9, %c0_10] : memref<8x32xf32, #tpu.memory_space<vmem>>, vector<8x32xf32>
    tpu.vector_store %arg4[%c0_9, %c0_10], %16 {strides = array<i32>} : memref<8x32xf32, #tpu.memory_space<vmem>>, vector<8x32xf32>,
    return
  }
  func.func @transform_0(%arg0: i32) -> (i32, i32) {
    %c0_i32 = arith.constant 0 : i32
    %c0_i32_0 = arith.constant 0 : i32
    return %arg0, %c0_i32 : i32, i32
  }
  func.func @transform_1(%arg0: i32) -> (i32, i32) {
    %c0_i32 = arith.constant 0 : i32
    %c0_i32_0 = arith.constant 0 : i32
    return %arg0, %c0_i32 : i32, i32
  }
  func.func @transform_2(%arg0: i32) -> (i32, i32) {
    %c0_i32 = arith.constant 0 : i32
    %c0_i32_0 = arith.constant 0 : i32
    %c0_i32_1 = arith.constant 0 : i32
    return %c0_i32, %c0_i32_0 : i32, i32
  }
  func.func @transform_3(%arg0: i32) -> (i32, i32) {
    %c0_i32 = arith.constant 0 : i32
    %c0_i32_0 = arith.constant 0 : i32
    return %arg0, %c0_i32 : i32, i32
  }
  func.func @transform_4(%arg0: i32) -> (i32, i32) {
    %c0_i32 = arith.constant 0 : i32
    %c0_i32_0 = arith.constant 0 : i32
    return %arg0, %c0_i32 : i32, i32
  }
}

</mosaic_0001>

<bundles_post_ra>
// kernel: tpu_custom_call.1
= control target key start
LH: loop header
LB: loop body
LE: loop exit
PB: predicated region body
PF: predicated region fallthrough
CT: control target
= control target key end

     0   :  { %10 = vsyncpa [#allocation3], 0  ;;  %s928_s0 = inlined_call_operand.hbm [shape: f32[16,32], index: 0, kind: input, shape index: {}]   ;;  %s929_s1 = inlined_call_operand.hbm [shape: f32[16,32], index: 1, kind: input, shape index: {}]   ;;  %s930_s2 = inlined_call_operand.vmem [shape: f32[1,32], index: 2, kind: input, shape index: {}]   ;;  %s931_s3 = inlined_call_operand.hbm [shape: f32[16,32], index: 3, kind: output, shape index: {0}]   ;;  %s932_s4 = inlined_call_operand.hbm [shape: f32[16,32], index: 4, kind: output, shape index: {1}]  }
   0x1   :  { %12 = vsyncpa [#allocation3 + $0x1], 0 }
   0x2   :  { %13 = vsyncpa [#allocation6], 0 }
   0x3   :  { %15 = vsyncpa [#allocation6 + $0x1], 0 }
   0x4   :  { %16 = vsyncpa [#allocation4], 0 }
   0x5   :  { %18 = vsyncpa [#allocation4 + $0x1], 0 }
   0x6   :  { %19 = vsyncpa [#allocation9], 0 }
   0x7   :  { %21 = vsyncpa [#allocation9 + $0x1], 0  ;;  %s702_s15 = smov 0   ;;  %s704_s16 = smov 0  }
   0x8   :  { %s706_s17 = smov 0   ;;  %s708_s18 = smov 0  }
   0x9 LB: > { %s723_s19 = sadd.s32 4294967295, %s671_s18   ;;  %s440_s20 = sadd.s32 4294967294, %s671_s18   ;;  %s671_s18 = sphi %s708_s18, %s951_s18   ;;  %s667_s17 = sphi %s706_s17, %s950_s17   ;;  %s663_s16 = sphi %s704_s16, %s949_s16   ;;  %s659_s15 = sphi %s702_s15, %s948_s15  }
   0xa   : > { %s727_s21 = sadd.s32 1, %s671_s18   ;;  %s34_s22 = sadd.s32 1, %s667_s17 }
   0xb   : > { %s31_s23 = ssub.s32 %s671_s18, %s727_s21  ;;  %p41_p0 = scmp.ne.s32.totalorder %s667_s17, %s663_s16 }
   0xc   : > { %p32_p1 = scmp.eq.s32.totalorder %s31_s23, 0  ;;  %p42_p2 = scmp.eq.s32.totalorder %s671_s18, 0 }
   0xd   : > { %p47_p3 = scmp.ne.s32.totalorder %s663_s16, %s659_s15  ;;  %p48_p4 = scmp.eq.s32.totalorder %s723_s19, 0 }
   0xe   : > { %s739_s24 = scalar_select %p32_p1, %s667_s17, %s34_s22  }
   0xf   : > { %p741_p5 = por %p42_p2, %p41_p0  ;;  %p745_p6 = por %p48_p4, %p47_p3 }
  0x10   : > { %p118_p7 = scmp.eq.s32.totalorder %s723_s19, 1  ;;  %p124_p8 = scmp.eq.s32.totalorder %s440_s20, 1 }
  0x11   : > { %s936_s26 = scalar_select %p745_p6, 1, 0 }
  0x12   : > { %p481_p10 = scmp.lt.s32.totalorder %s671_s18, 2  ;;  %p752_p11 = por %p118_p7, %p41_p0 }
  0x13   : > { %p756_p12 = por %p124_p8, %p47_p3  ;;  %s761_s29 = sand.u32 1, %s667_s17  }
  0x14   : > { %s937_s27 = scalar_select %p752_p11, 1, 0 }
  0x15   : > { %s938_s28 = scalar_select %p756_p12, 1, 0 }
  0x16   : > { %s444_s30 = sshll.u32 %s671_s18, 7  ;;  %s443_s5 = sshll.u32 %s761_s29, 3 }
  0x17   : > { %s770_s8 = scalar_lea.hbm %s928_s0, %s444_s30  ;;  %s177_s9 = scalar_lea.vmem [#allocation2], %s443_s5 }
  0x18   : > { %s184_s10 = sshll.u32 %s177_s9, 4  ;;  %p776_p13 = pnand %p481_p10, %p741_p5  ;;  %s780_s10 = int_to_ptr.vmem [resolvable:$true] %s184_s10 }
  0x19   : > { %s174_s12 = scalar_lea.sflag [#allocation3], %s761_s29  ;;  %s517_s13 = scalar_lea.hbm %s770_s8, 128 }
  0x1a   : > { %p518_p2 = scmp.ne.s32.totalorder %s770_s8, %s517_s13  ;;  %p519_p3 = pneg %p776_p13 }
  0x1b   : > { %s522_s22 = scalar_lea.hbm %s928_s0, 256  ;;  %p523_p5 = scmp.lt.s32.totalorder %s770_s8, %s928_s0 }
  0x1c   : > { %p520_p4 = pnand %p519_p3, %p518_p2  ;;  %p524_p8 = scmp.lt.s32.totalorder %s522_s22, %s517_s13 }
  0x1e   : > { %p521_p7 = pneg %p520_p4  ;;  %p525_p10 = por %p524_p8, %p523_p5 }
  0x20   : > { %p526_p9 = pnand %p525_p10, %p521_p7 }
  0x22   : > { %529 = shalt.err (!%p526_p9)
}
  0x23   : > { %s530_s6 = scalar_lea.vmem %s780_s10, 128  ;;  %s673_s7 = smov [#allocation2]  }
  0x24   : > { %p531_p0 = scmp.ne.s32.totalorder %s780_s10, %s530_s6  ;;  %s535_s9 = sshll.u32 %s673_s7, 4  ;;  %s536_s9 = int_to_ptr.vmem [resolvable:$false] %s535_s9 }
  0x25   : > { %s537_s14 = scalar_lea.vmem %s536_s9, 256  ;;  %p538_p1 = scmp.lt.s32.totalorder %s780_s10, %s536_s9 }
  0x26   : > { %p533_p2 = pnand %p531_p0, %p519_p3  ;;  %p539_p12 = scmp.lt.s32.totalorder %s537_s14, %s530_s6 }
  0x28   : > { %p534_p4 = pneg %p533_p2  ;;  %p540_p11 = por %p539_p12, %p538_p1 }
  0x2a   : > { %p541_p5 = pnand %p540_p11, %p534_p4 }
  0x2c   : > { %544 = shalt.err (!%p541_p5)
}
  0x2d   : > { %470 = dma.hbm_to_vmem [thread:$0]  (!%p776_p13), %s770_s8, 128, %s780_s10, %s174_s12  }
  0x2e   : > { %p940_p9 = scmp.lt.s32.totalorder %s671_s18, 3  ;;  %p941_p0 = scmp.ge.s32.totalorder %s671_s18, 1 }
  0x2f   : > { %s822_s23 = scalar_lea.hbm %s929_s1, %s444_s30  ;;  %s195_s25 = scalar_lea.vmem [#allocation5], %s443_s5 }
  0x30   : > { %p813_p7 = pnand %p941_p0, %p940_p9  ;;  %s202_s6 = sshll.u32 %s195_s25, 4  ;;  %s203_s6 = int_to_ptr.vmem [resolvable:$true] %s202_s6 }
  0x31   : > { %s192_s8 = scalar_lea.sflag [#allocation6], %s761_s29  ;;  %s545_s10 = scalar_lea.hbm %s822_s23, 128 }
  0x32   : > { %s942_s13 = scalar_select %p813_p7, 1, 0 }
  0x33   : > { %p546_p11 = scmp.ne.s32.totalorder %s822_s23, %s545_s10  ;;  %s550_s9 = scalar_lea.hbm %s929_s1, 256 }
  0x34   : > { %p551_p8 = scmp.lt.s32.totalorder %s822_s23, %s929_s1  ;;  %p552_p10 = scmp.lt.s32.totalorder %s550_s9, %s545_s10 }
  0x35   : > { %p548_p12 = pnand %p546_p11, %p519_p3 }
  0x36   : > { %p553_p2 = por %p552_p10, %p551_p8 }
  0x37   : > { %p549_p1 = pneg %p548_p12 }
  0x39   : > { %p554_p4 = pnand %p553_p2, %p549_p1 }
  0x3b   : > { %557 = shalt.err (!%p554_p4)
}
  0x3c   : > { %s558_s5 = scalar_lea.vmem %s203_s6, 128  ;;  %s674_s29 = smov [#allocation5]  }
  0x3d   : > { %p559_p5 = scmp.ne.s32.totalorder %s203_s6, %s558_s5  ;;  %s563_s20 = sshll.u32 %s674_s29, 4  ;;  %s564_s20 = int_to_ptr.vmem [resolvable:$false] %s563_s20 }
  0x3e   : > { %s565_s22 = scalar_lea.vmem %s564_s20, 256  ;;  %p566_p11 = scmp.lt.s32.totalorder %s203_s6, %s564_s20 }
  0x3f   : > { %p561_p9 = pnand %p559_p5, %p519_p3  ;;  %p567_p12 = scmp.lt.s32.totalorder %s565_s22, %s558_s5 }
  0x41   : > { %p562_p0 = pneg %p561_p9  ;;  %p568_p6 = por %p567_p12, %p566_p11 }
  0x43   : > { %p569_p7 = pnand %p568_p6, %p562_p0 }
  0x45   : > { %572 = shalt.err (!%p569_p7)
}
  0x46   : > { %473 = dma.hbm_to_vmem [thread:$0]  (!%p776_p13), %s822_s23, 128, %s203_s6, %s192_s8  }
  0x47   : > { %p943_p1 = scmp.ne.s32.totalorder %s942_s13, 0 }
  0x48   : > { %s848_s25 = sand.u32 (!%p943_p1), 1, %s663_s16   ;;  %p944_p6 = scmp.ne.s32.totalorder (!%p943_p1), %s936_s26, 0 }
  0x49   : > { %211 = sbr.rel (%p943_p1) target bundleno = 260 (0x104), region = 32  ;;  %s851_s10 = sshll.u32 (!%p943_p1), %s848_s25, 3 }
  0x4a   : > { %s214_s12 = scalar_lea.sflag (!%p943_p1), [#allocation3], %s848_s25  ;;  %s217_s7 = scalar_lea.vmem (!%p943_p1), [#allocation2], %s851_s10 }
  0x4e   : > { %642 = dma.done.wait (%p944_p6), %s214_s12, 128  }
  0x4f   : > { %644 = vsyncadd (%p944_p6), %s214_s12, 4294967168  ;;  %s223_s11 = scalar_lea.sflag [#allocation6], %s848_s25  ;;  %s226_s13 = scalar_lea.vmem [#allocation5], %s851_s10 }
  0x50   : > { %646 = dma.done.wait (%p944_p6), %s223_s11, 128  }
  0x51   : > { %648 = vsyncadd (%p944_p6), %s223_s11, 4294967168  ;;  %v261_v0 = vld [vmem:[%s217_s7] sm:$0xff]  ;;  %v262_v1 = vld [vmem:[%s226_s13] sm:$0xff]  ;;  %vm264_vm0 = vcmask 261120   ;;  %s455_s23 = sshll.u32 %s723_s19, 7  ;;  %s260_s6 = scalar_lea.vmem [#allocation8], %s851_s10 }
  0x52   : > { %v263_v2 = vadd.f32 %v262_v1, %v261_v0  ;;  %s313_s9 = scalar_lea.hbm %s932_s4, %s455_s23  ;;  %s315_s30 = sshll.u32 %s260_s6, 4  ;;  %s316_s30 = int_to_ptr.vmem [resolvable:$true] %s315_s30 }
  0x53   : > { %s289_s14 = scalar_lea.sflag [#allocation9], %s848_s25  ;;  %s573_s5 = scalar_lea.vmem %s316_s30, 128 }
  0x54   : > { %v266_v3 = vmul.f32 %v263_v2, %v263_v2  ;;  %265 = vst.msk [vmem:[%s260_s6] sm:$0xff] %vm264_vm0, %v263_v2  ;;  %p574_p13 = scmp.ne.s32.totalorder %s316_s30, %s573_s5  ;;  %p945_p3 = scmp.ne.s32.totalorder %s937_s27, 0 }
  0x55   : > { %s675_s29 = smov [#allocation8]  }
  0x56   : > { %v267_v4 = vsel %vm264_vm0, %v266_v3, 0.0  ;;  %p575_p7 = pnand %p574_p13, %p945_p3  ;;  %s577_s20 = sshll.u32 %s675_s29, 4  ;;  %s578_s20 = int_to_ptr.vmem [resolvable:$false] %s577_s20 }
  0x57   : > { %268 = vadd.xlane.f32.xlu0 %v267_v4  ;;  %s579_s22 = scalar_lea.vmem %s578_s20, 256  ;;  %p580_p10 = scmp.lt.s32.totalorder %s316_s30, %s578_s20 }
  0x58   : > { %p576_p8 = pneg %p575_p7  ;;  %p581_p2 = scmp.lt.s32.totalorder %s579_s22, %s573_s5 }
  0x5a   : > { %p582_p4 = por %p581_p2, %p580_p10 }
  0x5c   : > { %p583_p5 = pnand %p582_p4, %p576_p8 }
  0x5e   : > { %586 = shalt.err (!%p583_p5)
}
  0x5f   : > { %s587_s12 = scalar_lea.hbm %s313_s9, 128  ;;  %s591_s13 = scalar_lea.hbm %s932_s4, 256 }
  0x60   : > { %p588_p9 = scmp.ne.s32.totalorder %s313_s9, %s587_s12  ;;  %p592_p12 = scmp.lt.s32.totalorder %s313_s9, %s932_s4 }
  0x61   : > { %p593_p1 = scmp.lt.s32.totalorder %s591_s13, %s587_s12 }
  0x62   : > { %p589_p0 = pnand %p588_p9, %p945_p3 }
  0x63   : > { %p594_p6 = por %p593_p1, %p592_p12 }
  0x64   : > { %p590_p11 = pneg %p589_p0 }
  0x66   : > { %p595_p13 = pnand %p594_p6, %p590_p11 }
  0x68   : > { %598 = shalt.err (!%p595_p13)
}
  0x69   : > { %464 = dma.vmem_to_hbm [thread:$0]  (%p945_p3), %s316_s30, 128, %s313_s9, %s289_s14   ;;  %v452_v9 = vld [vmem:[%s930_s2] ss:$0 sm:$0xff] }
  0x6a   : > { %s253_s29 = scalar_lea.vmem [#allocation7], %s851_s10  ;;  %s300_s7 = scalar_lea.hbm %s931_s3, %s455_s23 }
  0x6b   : > { %s302_s20 = sshll.u32 %s253_s29, 4  ;;  %s284_s9 = scalar_lea.sflag [#allocation4], %s848_s25  ;;  %s303_s20 = int_to_ptr.vmem [resolvable:$true] %s302_s20 }
  0x6c   : > { %s599_s30 = scalar_lea.vmem %s303_s20, 128  ;;  %s676_s14 = smov [#allocation7]  }
  0x6d   : > { %p600_p7 = scmp.ne.s32.totalorder %s303_s20, %s599_s30  ;;  %s603_s11 = sshll.u32 %s676_s14, 4  ;;  %s604_s11 = int_to_ptr.vmem [resolvable:$false] %s603_s11 }
  0x6e   : > { %s605_s10 = scalar_lea.vmem %s604_s11, 256  ;;  %p606_p2 = scmp.lt.s32.totalorder %s303_s20, %s604_s11 }
  0x6f   : > { %p601_p8 = pnand %p600_p7, %p945_p3  ;;  %p607_p4 = scmp.lt.s32.totalorder %s605_s10, %s599_s30 }
  0x71   : > { %p602_p10 = pneg %p601_p8  ;;  %p608_p5 = por %p607_p4, %p606_p2 }
  0x73   : > { %p609_p9 = pnand %p608_p5, %p602_p10 }
  0xe0   : > { %v269_v5 = vpop.xlane.xlu0 %268 }
  0xe1   : > { %v270_v6 = vmul.f32 0.03125, %v269_v5 }
  0xe3   : > { %v271_v7 = vadd.f32 1e-05, %v270_v6 }
  0xe5   : > { %515 = vrsqrt.f32 %v271_v7 }
  0xf2   : > { %v516_v8 = vpop.eup %515 }
  0xf3   : > { %v273_v10 = vmul.f32 %v516_v8, %v263_v2 }
  0xf5   : > { %v281_v11 = vmul.f32 %v452_v9, %v273_v10 }
  0xf7   : > { %282 = vst.msk [vmem:[%s253_s29] sm:$0xff] %vm264_vm0, %v281_v11 }
  0xf8   : > { %612 = shalt.err (!%p609_p9)
}
  0xf9   : > { %s613_s19 = scalar_lea.hbm %s300_s7, 128  ;;  %s617_s13 = scalar_lea.hbm %s931_s3, 256 }
  0xfa   : > { %p614_p0 = scmp.ne.s32.totalorder %s300_s7, %s613_s19  ;;  %p618_p1 = scmp.lt.s32.totalorder %s300_s7, %s931_s3 }
  0xfb   : > { %p619_p6 = scmp.lt.s32.totalorder %s617_s13, %s613_s19 }
  0xfc   : > { %p615_p11 = pnand %p614_p0, %p945_p3 }
  0xfd   : > { %p620_p13 = por %p619_p6, %p618_p1 }
  0xfe   : > { %p616_p12 = pneg %p615_p11 }
 0x100   : > { %p621_p7 = pnand %p620_p13, %p616_p12 }
 0x102   : > { %624 = shalt.err (!%p621_p7)
}
 0x103   : > { %463 = dma.vmem_to_hbm [thread:$0]  (%p945_p3), %s303_s20, 128, %s300_s7, %s284_s9  }
 0x104 PF: > { %s327_s8 = sand.u32 1, %s659_s15   ;;  %p946_p8 = scmp.ne.s32.totalorder %s938_s28, 0 }
 0x105   : > { %p947_p10 = scmp.ge.s32.totalorder %s671_s18, 2  ;;  %s328_s5 = scalar_lea.sflag [#allocation4], %s327_s8 }
 0x107   : > { %p475_p2 = pnand %p947_p10, %p946_p8 }
 0x109   : > { %p476_p4 = pneg %p475_p2 }
 0x10b   : > { %650 = dma.done.wait (%p476_p4), %s328_s5, 128  }
 0x10c   : > { %652 = vsyncadd (%p476_p4), %s328_s5, 4294967168  ;;  %s337_s29 = scalar_lea.sflag [#allocation9], %s327_s8 }
 0x10d   : > { %654 = dma.done.wait (%p476_p4), %s337_s29, 128  }
 0x10e   : > { %656 = vsyncadd (%p476_p4), %s337_s29, 4294967168  ;;  %p24_p3 = scmp.ge.s32.totalorder %s727_s21, 4   ;;  %s948_s15 = smov %s663_s16 }
 0x10f   : > { %s949_s16 = smov %s667_s17  ;;  %s950_s17 = smov %s739_s24 }
 0x110   : > { %s951_s18 = smov %s727_s21  ;;  %26 = sbr.rel (!%p24_p3) target bundleno = 9 (0x9), region = 107 }
 0x115   :  { %342 = vsyncpa [#allocation3], 1 }
 0x116   :  { %344 = vsyncpa [#allocation3 + $0x1], 1 }
 0x117   :  { %345 = vsyncpa [#allocation6], 1 }
 0x118   :  { %347 = vsyncpa [#allocation6 + $0x1], 1 }
 0x119   :  { %348 = vsyncpa [#allocation4], 1 }
 0x11a   :  { %350 = vsyncpa [#allocation4 + $0x1], 1 }
 0x11b   :  { %351 = vsyncpa [#allocation9], 1 }
 0x11c   :  { %353 = vsyncpa [#allocation9 + $0x1], 1 }

</bundles_post_ra>
